<compile_context>
chip_gen: v7x
topology: tpu7x:2x2x1
jax: 0.10.0
libtpu: 0.0.40
codegen_flags: <defaults>
</compile_context>

<pallas_src>
import jax
import jax.numpy as jnp
from jax.experimental import pallas as pl
from jax.experimental.pallas import tpu as pltpu


# --------------------------------------------------------------------------
# Kernel
# --------------------------------------------------------------------------
def _decoder_kernel(x_ref, c_ref, whlin_ref, bh_ref, wclin_ref, bc_ref,
                    wx_ref, b_ref, wh_ref, out_ref,
                    h_sc, c_sc, xproj_sc):
    """grid = (seq_len,).  Everything step-invariant is done once at t == 0;
    per step only the recurrent h @ Wh matmul + gate nonlinearities run."""
    t = pl.program_id(0)
    H = c_sc.shape[-1]

    @pl.when(t == 0)
    def _init():
        x = x_ref[...]
        h_sc[...] = (jnp.dot(x, whlin_ref[...],
                             preferred_element_type=jnp.float32) + bh_ref[...])
        c_sc[...] = (jnp.dot(c_ref[...], wclin_ref[...],
                             preferred_element_type=jnp.float32) + bc_ref[...])
        xproj_sc[...] = (jnp.dot(x, wx_ref[...],
                                 preferred_element_type=jnp.float32) + b_ref[...])

    gates = xproj_sc[...] + jnp.dot(
        h_sc[...].astype(wh_ref.dtype), wh_ref[...],
        preferred_element_type=jnp.float32)

    # gate order (i, f, o, g): one sigmoid over the contiguous [B, 3H] slab,
    # one tanh over the trailing [B, H] slab.
    ifo = jax.nn.sigmoid(gates[:, :3 * H])
    g_cand = jnp.tanh(gates[:, 3 * H:])
    i_g = ifo[:, 0 * H:1 * H]
    f_g = ifo[:, 1 * H:2 * H]
    o_g = ifo[:, 2 * H:3 * H]

    c_next = f_g * c_sc[...] + i_g * g_cand        # f32 state (no bf16 drift)
    h_next = o_g * jnp.tanh(c_next)

    c_sc[...] = c_next
    h_sc[...] = h_next
    out_ref[...] = h_next.astype(out_ref.dtype)    # block (None, B, H) -> (B, H)


# --------------------------------------------------------------------------
# Wrapper
# --------------------------------------------------------------------------
def lstm_decoder(x, c, params, *, seq_len, matmul_dtype=jnp.float32,
                 out_dtype=None):
    """Pallas forward of LSTM_decoder.  x, c: [B, hidden_size]."""
    B, In = x.shape
    H = params["b_h"].shape[-1]                 # output_size == LSTM hidden
    out_dtype = out_dtype or x.dtype

    # MXU operands may be bf16; biases / accumulators / state stay float32.
    xm = x.astype(matmul_dtype)
    cm = c.astype(matmul_dtype)
    W_h = params["W_h"].astype(matmul_dtype)
    W_c = params["W_c"].astype(matmul_dtype)
    Wx = params["Wx"].astype(matmul_dtype)
    Wh = params["Wh"].astype(matmul_dtype)
    b_h = params["b_h"].astype(jnp.float32)
    b_c = params["b_c"].astype(jnp.float32)
    b = params["b"].astype(jnp.float32)

    # Every input is small & step-invariant: full-array blocks, index_map
    # constant -> DMA'd into VMEM once, resident across the whole sequence.
    def resident(shape):
        return pl.BlockSpec(shape, lambda t: tuple(0 for _ in shape))

    grid_spec = pltpu.PrefetchScalarGridSpec(
        num_scalar_prefetch=0,
        grid=(seq_len,),
        in_specs=[
            resident((B, In)),          # x
            resident((B, In)),          # c
            resident((In, H)),          # W_h   (linear_h)
            resident((1, H)),           # b_h
            resident((In, H)),          # W_c   (linear_c)
            resident((1, H)),           # b_c
            resident((In, 4 * H)),      # Wx    (x-part of fused gates)
            resident((1, 4 * H)),       # b     (fused gate bias)
            resident((H, 4 * H)),       # Wh    (recurrent gate weights)
        ],
        # one contiguous [B, H] slab per step; leading T dim squeezed away.
        out_specs=pl.BlockSpec((None, B, H), lambda t: (t, 0, 0)),
        scratch_shapes=[pltpu.VMEM((B, H), jnp.float32),       # h state
                        pltpu.VMEM((B, H), jnp.float32),       # c state
                        pltpu.VMEM((B, 4 * H), jnp.float32)],  # xproj (hoisted)
    )
    out_tbh = pl.pallas_call(
        _decoder_kernel,
        out_shape=jax.ShapeDtypeStruct((seq_len, B, H), out_dtype),
        grid_spec=grid_spec,
        compiler_params=pltpu.CompilerParams(
            dimension_semantics=("arbitrary",),   # true recurrence
            # resident weights + double-buffered output slabs; stays well
            # under v7x's 64 MiB physical VMEM.
            vmem_limit_bytes=48 * 1024 * 1024,
        ),
    )(xm, cm, W_h, b_h, W_c, b_c, Wx, b, Wh)

    # PyTorch stacks along dim=1 -> [B, T, H].
    return jnp.transpose(out_tbh, (1, 0, 2))


# --------------------------------------------------------------------------
# Params / reference
# --------------------------------------------------------------------------
def init_params(key, hidden_size, output_size, dtype=jnp.float32):
    """Deterministic init mimicking the nn.Linear layers of the module."""
    In, H = hidden_size, output_size
    keys = jax.random.split(key, 6)

    def lin(kw, kb, fan_in, fan_out):
        bound = 1.0 / (fan_in ** 0.5)
        w = jax.random.uniform(kw, (fan_in, fan_out), dtype, -bound, bound)
        bb = jax.random.uniform(kb, (1, fan_out), dtype, -bound, bound)
        return w, bb

    W_h, b_h = lin(keys[0], keys[1], In, H)          # linear_h
    W_c, b_c = lin(keys[2], keys[3], In, H)          # linear_c
    # fused gate weights over concat [x, h], gate order (i, f, o, g)
    w_full, b_full = lin(keys[4], keys[5], In + H, 4 * H)
    return dict(W_h=W_h, b_h=b_h, W_c=W_c, b_c=b_c,
                Wx=w_full[:In, :], Wh=w_full[In:, :], b=b_full)


def decoder_reference(x, c, params, *, seq_len):
    """Pure-JAX float32 reference of LSTM_decoder.forward."""
    H = params["b"].shape[-1] // 4
    h = x @ params["W_h"] + params["b_h"]
    cc = c @ params["W_c"] + params["b_c"]
    xproj = x @ params["Wx"] + params["b"]
    outs = []
    for _ in range(seq_len):
        gates = xproj + h @ params["Wh"]
        i = jax.nn.sigmoid(gates[:, 0 * H:1 * H])
        f = jax.nn.sigmoid(gates[:, 1 * H:2 * H])
        o = jax.nn.sigmoid(gates[:, 2 * H:3 * H])
        g = jnp.tanh(gates[:, 3 * H:4 * H])
        cc = f * cc + i * g
        h = o * jnp.tanh(cc)
        outs.append(h)
    return jnp.stack(outs, axis=1)


# --------------------------------------------------------------------------
# Test
# --------------------------------------------------------------------------
if __name__ == "__main__":
    batch, seq_len, hidden_size, output_size = 8, 8, 16, 32
    key = jax.random.PRNGKey(0)
    kx, kc, kp = jax.random.split(key, 3)

    x = jax.random.normal(kx, (batch, hidden_size), jnp.float32)
    c = jax.random.normal(kc, (batch, hidden_size), jnp.float32)
    params = init_params(kp, hidden_size, output_size)

    ref = decoder_reference(x, c, params, seq_len=seq_len)

    # float32 path — exact-math check of the fused time-loop kernel.
    out = lstm_decoder(x, c, params, seq_len=seq_len)
    jax.block_until_ready(out)
    assert out.shape == (batch, seq_len, output_size), out.shape
    assert jnp.allclose(out, ref, atol=1e-5), "f32 kernel mismatch"

    # bf16-MXU path — weights / x / c / h cast to bf16 for matmuls, state f32.
    out_bf16 = lstm_decoder(x, c, params, seq_len=seq_len,
                            matmul_dtype=jnp.bfloat16)
    jax.block_until_ready(out_bf16)
    assert jnp.allclose(out_bf16, ref, atol=1e-1), "bf16 kernel drifted"

    print("KERNEL_OK")
</pallas_src>

<mosaic_0001>
module attributes {stable_mosaic.version = 11 : i64} {
  func.func @_decoder_kernel(%arg0: i32, %arg1: memref<8x16xf32, #tpu.memory_space<vmem>>, %arg2: memref<8x16xf32, #tpu.memory_space<vmem>>, %arg3: memref<16x32xf32, #tpu.memory_space<vmem>>, %arg4: memref<1x32xf32, #tpu.memory_space<vmem>>, %arg5: memref<16x32xf32, #tpu.memory_space<vmem>>, %arg6: memref<1x32xf32, #tpu.memory_space<vmem>>, %arg7: memref<16x128xf32, #tpu.memory_space<vmem>>, %arg8: memref<1x128xf32, #tpu.memory_space<vmem>>, %arg9: memref<32x128xf32, #tpu.memory_space<vmem>>, %arg10: memref<1x8x32xf32, #tpu.memory_space<vmem>>, %arg11: memref<8x32xf32, #tpu.memory_space<vmem>>, %arg12: memref<8x32xf32, #tpu.memory_space<vmem>>, %arg13: memref<8x128xf32, #tpu.memory_space<vmem>>) attributes {dimension_semantics = [#tpu.dimension_semantics<arbitrary>], iteration_bounds = array<i64: 8>, scalar_prefetch = 0 : i64, scratch_operands = 3 : i64, tpu.core_type = #tpu.core_type<tc>, window_params = [{pipeline_mode = #tpu.pipeline_mode<synchronous>, transform_indices = @transform_0, window_bounds = array<i64: 8, 16>}, {pipeline_mode = #tpu.pipeline_mode<synchronous>, transform_indices = @transform_1, window_bounds = array<i64: 8, 16>}, {pipeline_mode = #tpu.pipeline_mode<synchronous>, transform_indices = @transform_2, window_bounds = array<i64: 16, 32>}, {pipeline_mode = #tpu.pipeline_mode<synchronous>, transform_indices = @transform_3, window_bounds = array<i64: 1, 32>}, {pipeline_mode = #tpu.pipeline_mode<synchronous>, transform_indices = @transform_4, window_bounds = array<i64: 16, 32>}, {pipeline_mode = #tpu.pipeline_mode<synchronous>, transform_indices = @transform_5, window_bounds = array<i64: 1, 32>}, {pipeline_mode = #tpu.pipeline_mode<synchronous>, transform_indices = @transform_6, window_bounds = array<i64: 16, 128>}, {pipeline_mode = #tpu.pipeline_mode<synchronous>, transform_indices = @transform_7, window_bounds = array<i64: 1, 128>}, {pipeline_mode = #tpu.pipeline_mode<synchronous>, transform_indices = @transform_8, window_bounds = array<i64: 32, 128>}, {transform_indices = @transform_9, window_bounds = array<i64: 1, 8, 32>}]} {
    %c0_i32 = arith.constant 0 : i32
    %0 = arith.cmpi eq, %arg0, %c0_i32 : i32
    %1 = arith.extui %0 : i1 to i32
    %c0_i32_0 = arith.constant 0 : i32
    %2 = arith.cmpi ne, %1, %c0_i32_0 : i32
    scf.if %2 {
      %c0_16 = arith.constant 0 : index
      %c0_17 = arith.constant 0 : index
      %30 = vector.load %arg1[%c0_16, %c0_17] : memref<8x16xf32, #tpu.memory_space<vmem>>, vector<8x16xf32>
      %c0_18 = arith.constant 0 : index
      %c0_19 = arith.constant 0 : index
      %31 = vector.load %arg3[%c0_18, %c0_19] : memref<16x32xf32, #tpu.memory_space<vmem>>, vector<16x32xf32>
      %cst_20 = arith.constant dense<0.000000e+00> : vector<8x32xf32>
      %32 = tpu.matmul %30, %31, %cst_20 {dimension_numbers = #tpu.dot_dimension_numbers<[1], [0], [0], [1], [0, 0, 1, 1], [], []>} : vector<8x16xf32>, vector<16x32xf32>, vector<8x32xf32> -> vector<8x32xf32>
      %c0_21 = arith.constant 0 : index
      %c0_22 = arith.constant 0 : index
      %33 = vector.load %arg4[%c0_21, %c0_22] : memref<1x32xf32, #tpu.memory_space<vmem>>, vector<1x32xf32>
      %34 = vector.broadcast %33 : vector<1x32xf32> to vector<8x32xf32>
      %35 = arith.addf %32, %34 : vector<8x32xf32>
      %c0_23 = arith.constant 0 : index
      %c0_24 = arith.constant 0 : index
      %36 = vector.load %arg11[%c0_23, %c0_24] : memref<8x32xf32, #tpu.memory_space<vmem>>, vector<8x32xf32>
      tpu.vector_store %arg11[%c0_23, %c0_24], %35 {strides = array<i32>} : memref<8x32xf32, #tpu.memory_space<vmem>>, vector<8x32xf32>,
      %c0_25 = arith.constant 0 : index
      %c0_26 = arith.constant 0 : index
      %37 = vector.load %arg2[%c0_25, %c0_26] : memref<8x16xf32, #tpu.memory_space<vmem>>, vector<8x16xf32>
      %c0_27 = arith.constant 0 : index
      %c0_28 = arith.constant 0 : index
      %38 = vector.load %arg5[%c0_27, %c0_28] : memref<16x32xf32, #tpu.memory_space<vmem>>, vector<16x32xf32>
      %cst_29 = arith.constant dense<0.000000e+00> : vector<8x32xf32>
      %39 = tpu.matmul %37, %38, %cst_29 {dimension_numbers = #tpu.dot_dimension_numbers<[1], [0], [0], [1], [0, 0, 1, 1], [], []>} : vector<8x16xf32>, vector<16x32xf32>, vector<8x32xf32> -> vector<8x32xf32>
      %c0_30 = arith.constant 0 : index
      %c0_31 = arith.constant 0 : index
      %40 = vector.load %arg6[%c0_30, %c0_31] : memref<1x32xf32, #tpu.memory_space<vmem>>, vector<1x32xf32>
      %41 = vector.broadcast %40 : vector<1x32xf32> to vector<8x32xf32>
      %42 = arith.addf %39, %41 : vector<8x32xf32>
      %c0_32 = arith.constant 0 : index
      %c0_33 = arith.constant 0 : index
      %43 = vector.load %arg12[%c0_32, %c0_33] : memref<8x32xf32, #tpu.memory_space<vmem>>, vector<8x32xf32>
      tpu.vector_store %arg12[%c0_32, %c0_33], %42 {strides = array<i32>} : memref<8x32xf32, #tpu.memory_space<vmem>>, vector<8x32xf32>,
      %c0_34 = arith.constant 0 : index
      %c0_35 = arith.constant 0 : index
      %44 = vector.load %arg7[%c0_34, %c0_35] : memref<16x128xf32, #tpu.memory_space<vmem>>, vector<16x128xf32>
      %cst_36 = arith.constant dense<0.000000e+00> : vector<8x128xf32>
      %45 = tpu.matmul %30, %44, %cst_36 {dimension_numbers = #tpu.dot_dimension_numbers<[1], [0], [0], [1], [0, 0, 1, 1], [], []>} : vector<8x16xf32>, vector<16x128xf32>, vector<8x128xf32> -> vector<8x128xf32>
      %c0_37 = arith.constant 0 : index
      %c0_38 = arith.constant 0 : index
      %46 = vector.load %arg8[%c0_37, %c0_38] : memref<1x128xf32, #tpu.memory_space<vmem>>, vector<1x128xf32>
      %47 = vector.broadcast %46 : vector<1x128xf32> to vector<8x128xf32>
      %48 = arith.addf %45, %47 : vector<8x128xf32>
      %c0_39 = arith.constant 0 : index
      %c0_40 = arith.constant 0 : index
      %49 = vector.load %arg13[%c0_39, %c0_40] : memref<8x128xf32, #tpu.memory_space<vmem>>, vector<8x128xf32>
      tpu.vector_store %arg13[%c0_39, %c0_40], %48 {strides = array<i32>} : memref<8x128xf32, #tpu.memory_space<vmem>>, vector<8x128xf32>,
    } else {
    }
    %c0 = arith.constant 0 : index
    %c0_1 = arith.constant 0 : index
    %3 = vector.load %arg13[%c0, %c0_1] : memref<8x128xf32, #tpu.memory_space<vmem>>, vector<8x128xf32>
    %c0_2 = arith.constant 0 : index
    %c0_3 = arith.constant 0 : index
    %4 = vector.load %arg11[%c0_2, %c0_3] : memref<8x32xf32, #tpu.memory_space<vmem>>, vector<8x32xf32>
    %c0_4 = arith.constant 0 : index
    %c0_5 = arith.constant 0 : index
    %5 = vector.load %arg9[%c0_4, %c0_5] : memref<32x128xf32, #tpu.memory_space<vmem>>, vector<32x128xf32>
    %cst = arith.constant dense<0.000000e+00> : vector<8x128xf32>
    %6 = tpu.matmul %4, %5, %cst {dimension_numbers = #tpu.dot_dimension_numbers<[1], [0], [0], [1], [0, 0, 1, 1], [], []>} : vector<8x32xf32>, vector<32x128xf32>, vector<8x128xf32> -> vector<8x128xf32>
    %7 = arith.addf %3, %6 : vector<8x128xf32>
    %8 = vector.extract_strided_slice %7 {offsets = [0, 0], sizes = [8, 96], strides = [1, 1]} : vector<8x128xf32> to vector<8x96xf32>
    %9 = arith.negf %8 : vector<8x96xf32>
    %10 = math.exp %9 : vector<8x96xf32>
    %cst_6 = arith.constant 1.000000e+00 : f32
    %11 = vector.broadcast %cst_6 : f32 to vector<8x96xf32>
    %12 = arith.addf %11, %10 : vector<8x96xf32>
    %13 = arith.divf %11, %12 : vector<8x96xf32>
    %14 = vector.extract_strided_slice %7 {offsets = [0, 96], sizes = [8, 32], strides = [1, 1]} : vector<8x128xf32> to vector<8x32xf32>
    %15 = math.tanh %14 : vector<8x32xf32>
    %16 = vector.extract_strided_slice %13 {offsets = [0, 0], sizes = [8, 32], strides = [1, 1]} : vector<8x96xf32> to vector<8x32xf32>
    %17 = vector.extract_strided_slice %13 {offsets = [0, 32], sizes = [8, 32], strides = [1, 1]} : vector<8x96xf32> to vector<8x32xf32>
    %18 = vector.extract_strided_slice %13 {offsets = [0, 64], sizes = [8, 32], strides = [1, 1]} : vector<8x96xf32> to vector<8x32xf32>
    %c0_7 = arith.constant 0 : index
    %c0_8 = arith.constant 0 : index
    %19 = vector.load %arg12[%c0_7, %c0_8] : memref<8x32xf32, #tpu.memory_space<vmem>>, vector<8x32xf32>
    %20 = arith.mulf %17, %19 : vector<8x32xf32>
    %21 = arith.mulf %16, %15 : vector<8x32xf32>
    %22 = arith.addf %20, %21 : vector<8x32xf32>
    %23 = math.tanh %22 : vector<8x32xf32>
    %24 = arith.mulf %18, %23 : vector<8x32xf32>
    %c0_9 = arith.constant 0 : index
    %c0_10 = arith.constant 0 : index
    %25 = vector.load %arg12[%c0_9, %c0_10] : memref<8x32xf32, #tpu.memory_space<vmem>>, vector<8x32xf32>
    tpu.vector_store %arg12[%c0_9, %c0_10], %22 {strides = array<i32>} : memref<8x32xf32, #tpu.memory_space<vmem>>, vector<8x32xf32>,
    %c0_11 = arith.constant 0 : index
    %c0_12 = arith.constant 0 : index
    %26 = vector.load %arg11[%c0_11, %c0_12] : memref<8x32xf32, #tpu.memory_space<vmem>>, vector<8x32xf32>
    tpu.vector_store %arg11[%c0_11, %c0_12], %24 {strides = array<i32>} : memref<8x32xf32, #tpu.memory_space<vmem>>, vector<8x32xf32>,
    %c0_13 = arith.constant 0 : index
    %c0_14 = arith.constant 0 : index
    %c0_15 = arith.constant 0 : index
    %27 = vector.load %arg10[%c0_13, %c0_14, %c0_15] : memref<1x8x32xf32, #tpu.memory_space<vmem>>, vector<1x8x32xf32>
    %28 = vector.shape_cast %27 : vector<1x8x32xf32> to vector<8x32xf32>
    %29 = vector.shape_cast %24 : vector<8x32xf32> to vector<1x8x32xf32>
    tpu.vector_store %arg10[%c0_13, %c0_14, %c0_15], %29 {strides = array<i32>} : memref<1x8x32xf32, #tpu.memory_space<vmem>>, vector<1x8x32xf32>,
    return
  }
  func.func @transform_0(%arg0: i32) -> (i32, i32) {
    %c0_i32 = arith.constant 0 : i32
    %c0_i32_0 = arith.constant 0 : i32
    %c0_i32_1 = arith.constant 0 : i32
    return %c0_i32, %c0_i32_0 : i32, i32
  }
  func.func @transform_1(%arg0: i32) -> (i32, i32) {
    %c0_i32 = arith.constant 0 : i32
    %c0_i32_0 = arith.constant 0 : i32
    %c0_i32_1 = arith.constant 0 : i32
    return %c0_i32, %c0_i32_0 : i32, i32
  }
  func.func @transform_2(%arg0: i32) -> (i32, i32) {
    %c0_i32 = arith.constant 0 : i32
    %c0_i32_0 = arith.constant 0 : i32
    %c0_i32_1 = arith.constant 0 : i32
    return %c0_i32, %c0_i32_0 : i32, i32
  }
  func.func @transform_3(%arg0: i32) -> (i32, i32) {
    %c0_i32 = arith.constant 0 : i32
    %c0_i32_0 = arith.constant 0 : i32
    %c0_i32_1 = arith.constant 0 : i32
    return %c0_i32, %c0_i32_0 : i32, i32
  }
  func.func @transform_4(%arg0: i32) -> (i32, i32) {
    %c0_i32 = arith.constant 0 : i32
    %c0_i32_0 = arith.constant 0 : i32
    %c0_i32_1 = arith.constant 0 : i32
    return %c0_i32, %c0_i32_0 : i32, i32
  }
  func.func @transform_5(%arg0: i32) -> (i32, i32) {
    %c0_i32 = arith.constant 0 : i32
    %c0_i32_0 = arith.constant 0 : i32
    %c0_i32_1 = arith.constant 0 : i32
    return %c0_i32, %c0_i32_0 : i32, i32
  }
  func.func @transform_6(%arg0: i32) -> (i32, i32) {
    %c0_i32 = arith.constant 0 : i32
    %c0_i32_0 = arith.constant 0 : i32
    %c0_i32_1 = arith.constant 0 : i32
    return %c0_i32, %c0_i32_0 : i32, i32
  }
  func.func @transform_7(%arg0: i32) -> (i32, i32) {
    %c0_i32 = arith.constant 0 : i32
    %c0_i32_0 = arith.constant 0 : i32
    %c0_i32_1 = arith.constant 0 : i32
    return %c0_i32, %c0_i32_0 : i32, i32
  }
  func.func @transform_8(%arg0: i32) -> (i32, i32) {
    %c0_i32 = arith.constant 0 : i32
    %c0_i32_0 = arith.constant 0 : i32
    %c0_i32_1 = arith.constant 0 : i32
    return %c0_i32, %c0_i32_0 : i32, i32
  }
  func.func @transform_9(%arg0: i32) -> (i32, i32, i32) {
    %c0_i32 = arith.constant 0 : i32
    %c0_i32_0 = arith.constant 0 : i32
    %c0_i32_1 = arith.constant 0 : i32
    return %arg0, %c0_i32, %c0_i32_0 : i32, i32, i32
  }
}

</mosaic_0001>

<bundles_post_ra>
// kernel: tpu_custom_call.1
= control target key start
LH: loop header
LB: loop body
LE: loop exit
PB: predicated region body
PF: predicated region fallthrough
CT: control target
= control target key end

     0   :  { %s1619_s0 = inlined_call_operand.hbm [shape: f32[8,16], index: 0, kind: input, shape index: {}]   ;;  %s1620_s1 = inlined_call_operand.hbm [shape: f32[8,16], index: 1, kind: input, shape index: {}]   ;;  %s1621_s2 = inlined_call_operand.hbm [shape: f32[16,32], index: 2, kind: input, shape index: {}]   ;;  %s1622_s3 = inlined_call_operand.vmem [shape: f32[1,32], index: 3, kind: input, shape index: {}]   ;;  %s1623_s4 = inlined_call_operand.hbm [shape: f32[16,32], index: 4, kind: input, shape index: {}]   ;;  %s1624_s5 = inlined_call_operand.vmem [shape: f32[1,32], index: 5, kind: input, shape index: {}]   ;;  %s1625_s6 = inlined_call_operand.vmem [shape: f32[16,128], index: 6, kind: input, shape index: {}]   ;;  %s1626_s7 = inlined_call_operand.vmem [shape: f32[1,128], index: 7, kind: input, shape index: {}]   ;;  %s1627_s8 = inlined_call_operand.hbm [shape: f32[32,128], index: 8, kind: input, shape index: {}]   ;;  %s1628_s9 = inlined_call_operand.hbm [shape: f32[8,8,32], index: 9, kind: output, shape index: {}]  }
   0x1   :  { %1639 = sst [smem:[#allocation22_spill]] %s1620_s1 }
   0x2   :  { %14 = vsyncpa [#allocation6], 0 }
   0x3   :  { %15 = vsyncpa [#allocation9], 0 }
   0x4   :  { %16 = vsyncpa [#allocation12], 0 }
   0x5   :  { %17 = vsyncpa [#allocation7], 0 }
   0x6   :  { %19 = vsyncpa [#allocation7 + $0x1], 0  ;;  %s1346_s30 = smov 0   ;;  %s1348_s10 = smov 0  }
   0x7   :  { %s1350_s11 = smov 0   ;;  %s1352_s12 = smov 0  }
   0x8 LB: > { %1640 = sst [smem:[#allocation19_spill]] %s1273_s11  ;;  %s1367_s13 = sadd.s32 4294967295, %s1277_s12   ;;  %s1277_s12 = sphi %s1352_s12, %s1661_s12   ;;  %s1273_s11 = sphi %s1350_s11, %s1663_s11   ;;  %s1269_s10 = sphi %s1348_s10, %s1665_s10   ;;  %s1265_s30 = sphi %s1346_s30, %s1664_s30  }
   0x9   : > { %s866_s14 = sadd.s32 4294967294, %s1277_s12   ;;  %s1371_s15 = sadd.s32 1, %s1277_s12  }
   0xa   : > { %1641 = sst [smem:[#allocation20_spill]] %s1371_s15  ;;  %s221_s16 = sadd.s32 1, %s1273_s11 }
   0xb   : > { %s218_s17 = ssub.s32 %s1277_s12, %s1371_s15  ;;  %p231_p0 = scmp.ne.s32.totalorder %s1273_s11, %s1269_s10 }
   0xc   : > { %p219_p1 = scmp.eq.s32.totalorder %s218_s17, 0  ;;  %p232_p2 = scmp.eq.s32.totalorder %s1367_s13, 7 }
   0xd   : > { %p237_p3 = scmp.ne.s32.totalorder %s1269_s10, %s1265_s30  ;;  %p238_p4 = scmp.eq.s32.totalorder %s866_s14, 7 }
   0xe   : > { %s1382_s18 = scalar_select %p219_p1, %s1273_s11, %s221_s16  }
   0xf   : > { %p1384_p5 = por %p232_p2, %p231_p0  ;;  %p1388_p6 = por %p238_p4, %p237_p3 }
  0x10   : > { %1642 = sst [smem:[#allocation21_spill]] %s1382_s18  ;;  %p867_p7 = scmp.ge.s32.totalorder %s1277_s12, 1 }
  0x11   : > { %s1643_s19 = scalar_select %p1384_p5, 1, 0 }
  0x12   : > { %s1644_s20 = scalar_select %p1388_p6, 1, 0 }
  0x13   : > { %p245_p8 = scmp.lt.s32.totalorder %s1277_s12, 9  ;;  %p1629_p10 = scmp.eq.s32.totalorder %s1367_s13, 0 }
  0x14   : > { %s1279_s22 = smov [#allocation8]   ;;  %s1280_s25 = smov [#allocation11]  }
  0x15   : > { %p1396_p11 = pnand %p867_p7, %p245_p8  ;;  %s269_s23 = sshll.u32 %s1279_s22, 4  ;;  %s270_s23 = int_to_ptr.vmem [resolvable:$true] %s269_s23 }
  0x16   : > { %s295_s26 = sshll.u32 %s1280_s25, 4  ;;  %s1281_s27 = smov [#allocation5]   ;;  %s1408_s26 = int_to_ptr.vmem [resolvable:$true] %s295_s26 }
  0x17   : > { %s1645_s21 = scalar_select %p1396_p11, 1, 0 }
  0x18   : > { %p976_p12 = pneg %p1396_p11  ;;  %s1410_s28 = sshll.u32 %s1281_s27, 4  ;;  %s259_s28 = int_to_ptr.vmem [resolvable:$true] %s1410_s28 }
  0x19   : > { %s1647_s1 = sld [smem:[#allocation22_spill]] }
  0x1a   : > { %p1404_p13 = pnand %p1629_p10, %p976_p12 }
  0x1c   : > { %p1420_p1 = pneg %p1404_p13 }
  0x1f   : > { %s1063_s16 = scalar_lea.hbm %s1647_s1, 128 }
  0x20   : > { %p1064_p0 = scmp.ne.s32.totalorder %s1647_s1, %s1063_s16  ;;  %p1070_p4 = scmp.lt.u32.totalorder %s1063_s16, %s1647_s1 }
  0x22   : > { %p1066_p2 = pnand %p1420_p1, %p1064_p0 }
  0x24   : > { %p1067_p3 = pneg %p1066_p2 }
  0x26   : > { %p1072_p7 = pnand %p1070_p4, %p1067_p3 }
  0x28   : > { %1075 = shalt.err (!%p1072_p7)
}
  0x29   : > { %s1076_s29 = scalar_lea.vmem %s270_s23, 128  ;;  %p1084_p10 = scmp.lt.s32.totalorder %s270_s23, %s270_s23 }
  0x2a   : > { %p1077_p8 = scmp.ne.s32.totalorder %s270_s23, %s1076_s29  ;;  %p1085_p6 = scmp.lt.s32.totalorder %s1076_s29, %s1076_s29 }
  0x2c   : > { %p1079_p12 = pnand %p1077_p8, %p1420_p1  ;;  %p1086_p5 = por %p1085_p6, %p1084_p10 }
  0x2e   : > { %p1080_p9 = pneg %p1079_p12 }
  0x30   : > { %p1087_p11 = pnand %p1086_p5, %p1080_p9 }
  0x32   : > { %1090 = shalt.err (!%p1087_p11)
}
  0x33   : > { %982 = dma.hbm_to_vmem [thread:$0]  (!%p1404_p13), %s1647_s1, 128, %s270_s23, [#allocation9]  }
  0x34   : > { %s1091_s25 = scalar_lea.hbm %s1623_s4, 256 }
  0x35   : > { %p1092_p0 = scmp.ne.s32.totalorder %s1623_s4, %s1091_s25  ;;  %p1098_p5 = scmp.lt.u32.totalorder %s1091_s25, %s1623_s4 }
  0x37   : > { %p1094_p2 = pnand %p1092_p0, %p1420_p1 }
  0x39   : > { %p1095_p6 = pneg %p1094_p2 }
  0x3b   : > { %p1100_p9 = pnand %p1098_p5, %p1095_p6 }
  0x3d   : > { %1103 = shalt.err (!%p1100_p9)
}
  0x3e   : > { %s1104_s23 = scalar_lea.vmem %s1408_s26, 256  ;;  %p1112_p4 = scmp.lt.s32.totalorder %s1408_s26, %s1408_s26 }
  0x3f   : > { %p1105_p10 = scmp.ne.s32.totalorder %s1408_s26, %s1104_s23  ;;  %p1113_p7 = scmp.lt.s32.totalorder %s1104_s23, %s1104_s23 }
  0x41   : > { %p1107_p11 = pnand %p1105_p10, %p1420_p1  ;;  %p1114_p8 = por %p1113_p7, %p1112_p4 }
  0x43   : > { %p1108_p3 = pneg %p1107_p11 }
  0x45   : > { %p1115_p12 = pnand %p1114_p8, %p1108_p3 }
  0x47   : > { %1118 = shalt.err (!%p1115_p12)
}
  0x48   : > { %s1635_s11 = smov 128   ;;  %s1637_s15 = smov 8  }
  0x49   : > { %988 = dma.hbm_to_vmem [thread:$0]  (!%p1404_p13), %s1623_s4, 256, %s1408_s26, [#allocation12], %s1635_s11, %s1635_s11, %s1637_s15  }
  0x4a   : > { %s1119_s25 = scalar_lea.hbm %s1619_s0, 128 }
  0x4b   : > { %p1120_p0 = scmp.ne.s32.totalorder %s1619_s0, %s1119_s25  ;;  %p1126_p5 = scmp.lt.u32.totalorder %s1119_s25, %s1619_s0 }
  0x4d   : > { %p1122_p2 = pnand %p1120_p0, %p1420_p1 }
  0x4f   : > { %p1123_p6 = pneg %p1122_p2 }
  0x51   : > { %p1128_p9 = pnand %p1126_p5, %p1123_p6 }
  0x53   : > { %1131 = shalt.err (!%p1128_p9)
}
  0x54   : > { %s1132_s14 = scalar_lea.vmem %s259_s28, 128  ;;  %p1140_p4 = scmp.lt.s32.totalorder %s259_s28, %s259_s28 }
  0x55   : > { %p1133_p10 = scmp.ne.s32.totalorder %s259_s28, %s1132_s14  ;;  %p1141_p7 = scmp.lt.s32.totalorder %s1132_s14, %s1132_s14 }
  0x57   : > { %p1135_p11 = pnand %p1133_p10, %p1420_p1  ;;  %p1142_p8 = por %p1141_p7, %p1140_p4 }
  0x59   : > { %p1136_p3 = pneg %p1135_p11 }
  0x5b   : > { %p1143_p12 = pnand %p1142_p8, %p1136_p3 }
  0x5d   : > { %1146 = shalt.err (!%p1143_p12)
}
  0x5e   : > { %979 = dma.hbm_to_vmem [thread:$0]  (!%p1404_p13), %s1619_s0, 128, %s259_s28, [#allocation6]  }
  0x5f   : > { %s1284_s1 = smov [#allocation10]   ;;  %s1285_s22 = smov [#allocation13]  }
  0x60   : > { %s279_s16 = sshll.u32 %s1284_s1, 4  ;;  %s317_s25 = sshll.u32 %s1285_s22, 4  ;;  %s280_s16 = int_to_ptr.vmem [resolvable:$true] %s279_s16  ;;  %s318_s25 = int_to_ptr.vmem [resolvable:$true] %s317_s25 }
  0x61   : > { %s1147_s23 = scalar_lea.hbm %s1621_s2, 256 }
  0x62   : > { %p1148_p0 = scmp.ne.s32.totalorder %s1621_s2, %s1147_s23  ;;  %p1154_p5 = scmp.lt.u32.totalorder %s1147_s23, %s1621_s2 }
  0x64   : > { %p1150_p2 = pnand %p1148_p0, %p1420_p1 }
  0x66   : > { %p1151_p6 = pneg %p1150_p2 }
  0x68   : > { %p1156_p9 = pnand %p1154_p5, %p1151_p6 }
  0x6a   : > { %1159 = shalt.err (!%p1156_p9)
}
  0x6b   : > { %s1160_s28 = scalar_lea.vmem %s280_s16, 256  ;;  %p1168_p4 = scmp.lt.s32.totalorder %s280_s16, %s280_s16 }
  0x6c   : > { %p1161_p10 = scmp.ne.s32.totalorder %s280_s16, %s1160_s28  ;;  %p1169_p7 = scmp.lt.s32.totalorder %s1160_s28, %s1160_s28 }
  0x6e   : > { %p1163_p11 = pnand %p1161_p10, %p1420_p1  ;;  %p1170_p8 = por %p1169_p7, %p1168_p4 }
  0x70   : > { %p1164_p3 = pneg %p1163_p11 }
  0x72   : > { %p1171_p12 = pnand %p1170_p8, %p1164_p3 }
  0x74   : > { %1174 = shalt.err (!%p1171_p12)
}
  0x75   : > { %s1649_s11 = smov 8   ;;  %s1650_s17 = smov 128  }
  0x76   : > { %985 = dma.hbm_to_vmem [thread:$0]  (!%p1404_p13), %s1621_s2, 256, %s280_s16, [#allocation9], %s1650_s17, %s1650_s17, %s1649_s11  }
  0x77   : > { %s1175_s29 = scalar_lea.hbm %s1627_s8, 512 }
  0x78   : > { %p1176_p0 = scmp.ne.s32.totalorder %s1627_s8, %s1175_s29  ;;  %p1182_p5 = scmp.lt.u32.totalorder %s1175_s29, %s1627_s8 }
  0x7a   : > { %p1178_p2 = pnand %p1176_p0, %p1420_p1 }
  0x7c   : > { %p1179_p6 = pneg %p1178_p2 }
  0x7e   : > { %p1184_p9 = pnand %p1182_p5, %p1179_p6 }
  0x80   : > { %1187 = shalt.err (!%p1184_p9)
}
  0x81   : > { %s1188_s15 = scalar_lea.vmem %s318_s25, 512  ;;  %p1196_p4 = scmp.lt.s32.totalorder %s318_s25, %s318_s25 }
  0x82   : > { %p1189_p10 = scmp.ne.s32.totalorder %s318_s25, %s1188_s15  ;;  %p1197_p7 = scmp.lt.s32.totalorder %s1188_s15, %s1188_s15 }
  0x84   : > { %p1191_p11 = pnand %p1189_p10, %p1420_p1  ;;  %p1198_p8 = por %p1197_p7, %p1196_p4 }
  0x86   : > { %p1192_p3 = pneg %p1191_p11 }
  0x88   : > { %p1199_p12 = pnand %p1198_p8, %p1192_p3 }
  0x8a   : > { %1202 = shalt.err (!%p1199_p12)
}
  0x8b   : > { %991 = dma.hbm_to_vmem [thread:$0]  (!%p1404_p13), %s1627_s8, 512, %s318_s25, [#allocation12], %s1650_s17, %s1650_s17, %s1649_s11  }
  0x8c   : > { %p1651_p0 = scmp.ne.s32.totalorder %s1645_s21, 0 }
  0x8d   : > { %p1652_p1 = scmp.eq.s32.totalorder (!%p1651_p0), %s1367_s13, 0 }
  0x8e   : > { %333 = sbr.rel (%p1651_p0) target bundleno = 1108 (0x454), region = 56 }
  0x95   : > { %1248 = dma.done.wait (%p1652_p1), [#allocation6], 128   ;;  %p1653_p2 = pmov %p1652_p1 }
  0x96   : > { %p1654_p6 = pmov %p1652_p1 }
  0x97   : > { %1250 = vsyncadd (%p1653_p2), [#allocation6], 4294967168 }
  0x98   : > { %1252 = dma.done.wait (%p1654_p6), [#allocation9], 384   ;;  %p1655_p5 = pmov %p1652_p1 }
  0x99   : > { %p1656_p9 = pmov %p1652_p1 }
  0x9a   : > { %1254 = vsyncadd (%p1655_p5), [#allocation9], 4294966912 }
  0x9b   : > { %1256 = dma.done.wait (%p1656_p9), [#allocation12], 768   ;;  %p1657_p13 = pmov %p1652_p1 }
  0x9c   : > { %s377_s18 = sand.u32 1, %s1269_s10   ;;  %p1658_p10 = scmp.ne.s32.totalorder %s1367_s13, 0 }
  0x9d   : > { %1258 = vsyncadd (%p1657_p13), [#allocation12], 4294966528  ;;  %s1540_s21 = sshll.u32 %s377_s18, 3  ;;  %v385_v0 = vld [vmem:[#allocation10] sm:$0xff] (!%p1658_p10)  ;;  %v386_v1 = vld [vmem:[#allocation10 + $0x8] sm:$0xff] (!%p1658_p10)  ;;  %v1286_v2 = vmov (!%p1658_p10), 0.0|0.0  }
  0x9e   : > { %s379_s24 = scalar_lea.vmem [#allocation14], %s1540_s21  ;;  %383 = sbr.rel (%p1658_p10) target bundleno = 382 (0x17e), region = 80  ;;  %939 = vmatprep.subr.bf16.mxu0 (!%p1658_p10), %v1286_v2  ;;  %v940_v3 = vpack.c.bf16 (!%p1658_p10), %v386_v1, %v385_v0  ;;  %vm1287_vm0 = vmmov (!%p1658_p10), 0   ;;  %v1288_v4 = vmov (!%p1658_p10), 0.0   ;;  %v471_v5 = vld [vmem:[#allocation11] sm:$0xff] (!%p1658_p10)  ;;  %v472_v6 = vld [vmem:[#allocation11 + $0x8] sm:$0xff] (!%p1658_p10)  ;;  %942 = vmatprep.subr.bf16.mxu1 (!%p1658_p10), %v1286_v2 }
  0x9f   : > { %911 = vmatprep.mubr.msk.f32.mxu0 (!%p1658_p10), %vm1287_vm0, %v1288_v4  ;;  %v554_v7 = vld [vmem:[%s1625_s6] sm:$0xff] (!%p1658_p10)  ;;  %v943_v8 = vpack.c.bf16 (!%p1658_p10), %v472_v6, %v471_v5  ;;  %v555_v9 = vld [vmem:[%s1625_s6 + $0x8] sm:$0xff] (!%p1658_p10)  ;;  %918 = vmatprep.mubr.msk.f32.mxu1 (!%p1658_p10), %vm1287_vm0, %v1288_v4  ;;  %vm394_vm1 = vcmask (!%p1658_p10), 130048   ;;  %v470_v12 = vld [vmem:[#allocation8] sm:$0xff] (!%p1658_p10)  ;;  %vm468_vm2 = vcmask (!%p1658_p10), 261120  }
  0xa0   : > { %941 = vmatpush3.bf16.msra.mxu0 (!%p1658_p10), %v940_v3  ;;  %v384_v10 = vld [vmem:[#allocation5] sm:$0xff] (!%p1658_p10)  ;;  %v946_v11 = vpack.c.bf16 (!%p1658_p10), %v555_v9, %v554_v7  ;;  %v881_v13 = vld [vmem:[%s1622_s3] ss:$0 sm:$0xff] (!%p1658_p10) }
  0xa1   : > { %945 = vmatprep.subr.bf16.mxu0 (!%p1658_p10), %v1286_v2  ;;  %944 = vmatpush3.bf16.msra.mxu1 (!%p1658_p10), %v943_v8  ;;  %v883_v15 = vld [vmem:[%s1624_s5] ss:$0 sm:$0xff] (!%p1658_p10) }
  0xa2   : > { %v885_v19 = vld [vmem:[%s1626_s7] ss:$0 sm:$0xff] (!%p1658_p10) }
  0xa3   : > { %912 = vmatmul.mubr.msk.f32.vlgmr.msra.gmra.mrb[0].mxu0 (!%p1658_p10), %vm394_vm1, %v384_v10 }
  0xa4   : > { %947 = vmatpush3.bf16.msra.mxu0 (!%p1658_p10), %v946_v11  ;;  %925 = vmatprep.mubr.msk.f32.mxu0 (!%p1658_p10), %vm1287_vm0, %v1288_v4 }
  0xa5   : > { %919 = vmatmul.mubr.msk.f32.vlgmr.msra.gmra.mrb[0].mxu1 %vm394_vm1, %v470_v12 }
  0xa7   : > { %926 = vmatmul.mubr.msk.f32.vlgmr.msra.gmra.mrb[2].mxu0 %vm394_vm1, %v384_v10 }
 0x176   : > { %v464_v14 = vpop.f32.mrb[0].mxu0 }
 0x177   : > { %v465_v16 = vadd.f32 %v881_v13, %v464_v14  ;;  %v913_v17 = vpop.f32.mrb[1].mxu0 }
 0x178   : > { %v549_v18 = vpop.f32.mrb[0].mxu1 }
 0x179   : > { %469 = vst.msk [vmem:[#allocation2] sm:$0xff] %vm468_vm2, %v465_v16  ;;  %v550_v20 = vadd.f32 %v883_v15, %v549_v18  ;;  %v920_v21 = vpop.f32.mrb[1].mxu1 }
 0x17a   : > { %v629_v22 = vpop.f32.mrb[2].mxu0 }
 0x17b   : > { %553 = vst.msk [vmem:[#allocation3] sm:$0xff] %vm468_vm2, %v550_v20  ;;  %v630_v23 = vadd.f32 %v885_v19, %v629_v22  ;;  %v927_v24 = vpop.f32.mrb[3].mxu0 }
 0x17d   : > { %633 = vst [vmem:[#allocation4] sm:$0xff] %v630_v23 }
 0x17e PF: > { %v636_v25 = vld [vmem:[#allocation13] sm:$0xff]  ;;  %v637_v26 = vld [vmem:[#allocation13 + $0x8] sm:$0xff]  ;;  %v638_v27 = vld [vmem:[#allocation13 + $0x10] sm:$0xff]  ;;  %v1289_v28 = vmov 0.0|0.0   ;;  %vm1290_vm3 = vmmov 0   ;;  %v1291_v31 = vmov 0.0  }
 0x17f   : > { %948 = vmatprep.subr.bf16.mxu0 %v1289_v28  ;;  %v949_v29 = vpack.c.bf16 %v637_v26, %v636_v25  ;;  %v639_v30 = vld [vmem:[#allocation13 + $0x18] sm:$0xff]  ;;  %936 = vmatprep.mubr.msk.f32.mxu0 %vm1290_vm3, %v1291_v31  ;;  %vm640_vm4 = vcmask 261120   ;;  %s1292_s15 = smov 32   ;;  %s1293_s16 = smov 96  }
 0x180   : > { %v952_v32 = vpack.c.bf16 %v639_v30, %v638_v27  ;;  %v635_v33 = vld [vmem:[#allocation2] sm:$0xff]  ;;  %s1294_s1 = smov 64   ;;  %s890_s25 = sshll.u32 %s1367_s13, 7 }
 0x181   : > { %950 = vmatpush3.bf16.msra.mxu0 %v949_v29  ;;  %s769_s11 = sshll.u32 %s379_s24, 4  ;;  %s1571_s27 = scalar_lea.hbm %s1628_s9, %s890_s25  ;;  %s1573_s11 = int_to_ptr.vmem [resolvable:$true] %s769_s11 }
 0x182   : > { %951 = vmatprep.subr.bf16.mxu0 %v1289_v28  ;;  %v722_v39 = vld [vmem:[#allocation3] sm:$0xff]  ;;  %s756_s13 = scalar_lea.sflag [#allocation7], %s377_s18  ;;  %s1203_s29 = scalar_lea.vmem %s1573_s11, 128 }
 0x183   : > { %p1204_p11 = scmp.ne.s32.totalorder %s1573_s11, %s1203_s29  ;;  %p1659_p3 = scmp.ne.s32.totalorder %s1643_s19, 0 }
 0x184   : > { %v634_v34 = vld [vmem:[#allocation4] sm:$0xff]  ;;  %s1295_s23 = smov [#allocation14]  }
 0x185   : > { %953 = vmatpush3.bf16.msra.mxu0 %v952_v32  ;;  %p1205_p4 = pnand %p1204_p11, %p1659_p3  ;;  %s1207_s14 = sshll.u32 %s1295_s23, 4  ;;  %s1208_s14 = int_to_ptr.vmem [resolvable:$false] %s1207_s14 }
 0x186   : > { %s1209_s26 = scalar_lea.vmem %s1208_s14, 256  ;;  %p1210_p8 = scmp.lt.s32.totalorder %s1573_s11, %s1208_s14 }
 0x187   : > { %p1206_p7 = pneg %p1205_p4  ;;  %p1211_p12 = scmp.lt.s32.totalorder %s1209_s26, %s1203_s29 }
 0x188   : > { %937 = vmatmul.mubr.msk.f32.vlgmr.msra.gmra.mrb[0].mxu0 %vm640_vm4, %v635_v33 }
 0x189   : > { %p1212_p0 = por %p1211_p12, %p1210_p8 }
 0x18b   : > { %p1213_p1 = pnand %p1212_p0, %p1206_p7 }
 0x25b   : > { %v710_v35 = vpop.f32.mrb[0].mxu0 }
 0x25c   : > { %v714_v36 = vadd.f32 %v710_v35, %v634_v34  ;;  %v938_v37 = vpop.f32.mrb[1].mxu0 }
 0x25e   : > { %1055 = vtanh.f32 %v714_v36  ;;  %v888_v40 = vmul.f32 -1.442695, %v714_v36 }
 0x260   : > { %1057 = vpow2.f32 %v888_v40 }
 0x268   : > { %v1056_v38 = vpop.eup %1055 }
 0x269   : > { %729 = vrot.lane.b32.xlu0 %v1056_v38, %s1292_s15 }
 0x26a   : > { %v1058_v41 = vpop.eup %1057 }
 0x26b   : > { %v718_v42 = vadd.f32 1.0, %v1058_v41 }
 0x26d   : > { %724 = vrot.lane.b32.xlu0 %v722_v39, %s1292_s15  ;;  %1059 = vrcp.f32 %v718_v42 }
 0x277   : > { %v1060_v43 = vpop.eup %1059 }
 0x2db   : > { %v730_v44 = vpop.permute.xlu0 %729 }
 0x2dc   : > { %v732_v45 = vmul.f32 %v1060_v43, %v730_v44 }
 0x2de   : > { %734 = vrot.lane.b32.xlu1 %v732_v45, %s1292_s15 }
 0x2df   : > { %v725_v46 = vpop.permute.xlu0 %724 }
 0x2e0   : > { %v727_v47 = vmul.f32 %v1060_v43, %v725_v46 }
 0x350   : > { %v735_v48 = vpop.permute.xlu1 %734 }
 0x351   : > { %v737_v49 = vadd.f32 %v735_v48, %v727_v47 }
 0x353   : > { %1061 = vtanh.f32 %v737_v49 }
 0x35d   : > { %v1062_v50 = vpop.eup %1061 }
 0x35e   : > { %740 = vrot.lane.b32.xlu1 %v1062_v50, %s1292_s15 }
 0x362   : > { %745 = vrot.lane.b32.xlu1 %v737_v49, %s1293_s16 }
 0x3d0   : > { %v741_v51 = vpop.permute.xlu1 %740 }
 0x3d1   : > { %v743_v52 = vmul.f32 %v1060_v43, %v741_v51 }
 0x3d3   : > { %750 = vrot.lane.b32.xlu0 %v743_v52, %s1294_s1 }
 0x3d4   : > { %v746_v53 = vpop.permute.xlu1 %745 }
 0x3d5   : > { %748 = vst.msk [vmem:[#allocation3] sm:$0xff] %vm640_vm4, %v746_v53 }
 0x445   : > { %v751_v54 = vpop.permute.xlu0 %750 }
 0x446   : > { %753 = vst.msk [vmem:[#allocation2] sm:$0xff] %vm640_vm4, %v751_v54  ;;  %754 = vst.msk [vmem:[%s379_s24] sm:$0xff] %vm640_vm4, %v751_v54 }
 0x447   : > { %1216 = shalt.err (!%p1213_p1)
}
 0x448   : > { %s1217_s18 = scalar_lea.hbm %s1571_s27, 128  ;;  %s1221_s28 = scalar_lea.hbm %s1628_s9, 1024 }
 0x449   : > { %p1218_p2 = scmp.ne.s32.totalorder %s1571_s27, %s1217_s18  ;;  %p1222_p9 = scmp.lt.u32.totalorder %s1571_s27, %s1628_s9 }
 0x44a   : > { %p1223_p13 = scmp.lt.u32.totalorder %s1221_s28, %s1217_s18  ;;  %p1225_p11 = scmp.lt.u32.totalorder %s1217_s18, %s1571_s27 }
 0x44b   : > { %p1219_p6 = pnand %p1218_p2, %p1659_p3 }
 0x44c   : > { %p1224_p10 = por %p1223_p13, %p1222_p9 }
 0x44d   : > { %p1220_p5 = pneg %p1219_p6 }
 0x44e   : > { %p1226_p4 = por %p1225_p11, %p1224_p10 }
 0x450   : > { %p1227_p7 = pnand %p1226_p4, %p1220_p5 }
 0x452   : > { %1230 = shalt.err (!%p1227_p7)
}
 0x453   : > { %974 = dma.vmem_to_hbm [thread:$0]  (%p1659_p3), %s1573_s11, 128, %s1571_s27, %s756_s13  }
 0x454 PF: > { %p1006_p8 = scmp.ge.s32.totalorder %s1277_s12, 2  ;;  %s781_s1 = sand.u32 1, %s1265_s30  }
 0x455   : > { %p1660_p12 = scmp.ne.s32.totalorder %s1644_s20, 0  ;;  %s782_s25 = scalar_lea.sflag [#allocation7], %s781_s1 }
 0x457   : > { %p993_p0 = pnand %p1006_p8, %p1660_p12 }
 0x459   : > { %1260 = dma.done.wait (!%p993_p0), %s782_s25, 128  }
 0x45a   : > { %1262 = vsyncadd (!%p993_p0), %s782_s25, 4294967168  ;;  %s1661_s12 = sld [smem:[#allocation20_spill]]  ;;  %s1662_s17 = sld [smem:[#allocation19_spill]] }
 0x45b   : > { %s1663_s11 = sld [smem:[#allocation21_spill]]  ;;  %s1664_s30 = smov %s1269_s10 }
 0x460   : > { %p22_p1 = scmp.ge.s32.totalorder %s1661_s12, 10   ;;  %s1665_s10 = smov %s1662_s17 }
 0x462   :  { %24 = sbr.rel (!%p22_p1) target bundleno = 8 (0x8), region = 113 }
 0x469   :  { %787 = vsyncpa [#allocation6], 1 }
 0x46a   :  { %789 = vsyncpa [#allocation6 + $0x1], 1 }
 0x46b   :  { %790 = vsyncpa [#allocation9], 1 }
 0x46c   :  { %791 = vsyncpa [#allocation12], 1 }
 0x46d   :  { %792 = vsyncpa [#allocation7], 1 }
 0x46e   :  { %794 = vsyncpa [#allocation7 + $0x1], 1 }

</bundles_post_ra>
